<compile_context>
chip_gen: v5e
topology: v5e:2x2
jax: 0.10.0
libtpu: 0.0.40
codegen_flags: <defaults>
</compile_context>

<pallas_src>
import functools

import jax
import jax.numpy as jnp
from jax.experimental import pallas as pl
from jax.experimental.pallas import tpu as pltpu


def _mean_kernel(x_ref, w_ref, b_ref, mean_ref):
    # mean = x @ W + b   (MXU matmul with f32 accumulation + VPU bias add)
    acc = jnp.dot(x_ref[...], w_ref[...], preferred_element_type=jnp.float32)
    mean_ref[...] = (acc + b_ref[...].astype(jnp.float32)).astype(mean_ref.dtype)


def _round_up(v, m):
    return (v + m - 1) // m * m


@functools.partial(jax.jit, static_argnames=("tb", "min_pallas_rows"))
def diag_gaussian_forward(x, w, b, logstd, *, tb=4096, min_pallas_rows=2048):
    """x: (B, In), w: (In, Out), b: (1, Out), logstd: (1, Out).

    Returns (mean, std), each (B, Out) in x.dtype / f32.
    """
    B, In = x.shape
    Out = w.shape[1]
    out_dtype = x.dtype

    if B < min_pallas_rows:
        # Small-batch fast path: a fused XLA dot+add is strictly cheaper than a
        # pallas_call launch at these sizes.
        mean = (jnp.dot(x, w, preferred_element_type=jnp.float32)
                + b.astype(jnp.float32)).astype(out_dtype)
    else:
        # Sublane-aligned batch tile (multiple of 8) and padded batch extent.
        Bp = _round_up(B, 8)
        TB = min(_round_up(tb, 8), Bp)
        # Keep >=2 grid steps when the batch allows it (v7x dual TensorCore).
        if Bp // TB < 2 and Bp >= 16:
            TB = _round_up(Bp // 2, 8)
        Bp = _round_up(Bp, TB)

        x_p = x if Bp == B else jnp.pad(x, ((0, Bp - B), (0, 0)))

        itemsize = jnp.dtype(x.dtype).itemsize
        cost = pl.CostEstimate(
            flops=2 * Bp * In * Out,
            transcendentals=0,
            bytes_accessed=(itemsize * (Bp * In + In * Out + Out)
                            + jnp.dtype(out_dtype).itemsize * Bp * Out),
        )

        mean_p = pl.pallas_call(
            _mean_kernel,
            out_shape=jax.ShapeDtypeStruct((Bp, Out), out_dtype),
            grid=(Bp // TB,),
            in_specs=[
                pl.BlockSpec((TB, In), lambda i: (i, 0)),    # batch-tiled x
                pl.BlockSpec((In, Out), lambda i: (0, 0)),   # W resident across tiles
                pl.BlockSpec((1, Out), lambda i: (0, 0)),    # bias resident across tiles
            ],
            out_specs=pl.BlockSpec((TB, Out), lambda i: (i, 0)),
            compiler_params=pltpu.CompilerParams(
                dimension_semantics=("parallel",)),
            cost_estimate=cost,
        )(x_p, w, b)

        mean = mean_p if Bp == B else mean_p[:B, :]

    # std is batch-invariant: exp of the (1, Out) logstd bias, broadcast lazily
    # by XLA (no kernel writeback of a (B, Out) constant tensor).
    std = jnp.broadcast_to(jnp.exp(logstd.astype(jnp.float32)), (B, Out))
    return mean, std


class FixedNormal:
    """JAX-side equivalent of FixedNormal (glue on top of kernel outputs)."""
    # TODO(synk): sampling (rsample/sample) from torch.distributions.Normal is
    # not implemented; only mean/std/log_probs/entropy/mode are provided.

    def __init__(self, mean, std):
        self.mean = mean
        self.std = std

    def log_probs(self, x):
        var = self.std ** 2
        lp = (-((x - self.mean) ** 2) / (2.0 * var)
              - jnp.log(self.std) - 0.5 * jnp.log(2.0 * jnp.pi))
        return lp.sum(-1)

    def entropy(self):
        ent = 0.5 + 0.5 * jnp.log(2.0 * jnp.pi) + jnp.log(self.std)
        return ent.sum(-1)

    def mode(self):
        return self.mean


def diag_gaussian(x, w, b, logstd, **kwargs):
    mean, std = diag_gaussian_forward(x, w, b, logstd, **kwargs)
    return FixedNormal(mean, std)


if __name__ == "__main__":
    INPUT_DIM = 32
    OUTPUT_DIM = 8
    BATCH = 8

    key = jax.random.PRNGKey(0)
    kx, kw, kb = jax.random.split(key, 3)

    x = jax.random.normal(kx, (BATCH, INPUT_DIM), dtype=jnp.float32)

    # Deterministic "Linear" params (PyTorch shape: W (Out, In), b (Out,));
    # pass W pre-transposed as (In, Out).
    bound = 1.0 / (INPUT_DIM ** 0.5)
    w = jax.random.uniform(kw, (INPUT_DIM, OUTPUT_DIM),
                           minval=-bound, maxval=bound, dtype=jnp.float32)
    b = jax.random.uniform(kb, (1, OUTPUT_DIM),
                           minval=-bound, maxval=bound, dtype=jnp.float32)
    # AddBias initialized with torch.zeros(output_dim).
    logstd = jnp.zeros((1, OUTPUT_DIM), dtype=jnp.float32)

    # Force the Pallas path even at this small demo batch so the kernel runs.
    dist = diag_gaussian(x, w, b, logstd, min_pallas_rows=0)
    jax.block_until_ready(dist.mean)
    jax.block_until_ready(dist.std)

    # Reference check in plain JAX.
    ref_mean = x @ w + b
    ref_std = jnp.broadcast_to(jnp.exp(logstd), ref_mean.shape)
    assert dist.mean.shape == (BATCH, OUTPUT_DIM)
    assert dist.std.shape == (BATCH, OUTPUT_DIM)
    assert jnp.allclose(dist.mean, ref_mean, atol=1e-5, rtol=1e-5)
    assert jnp.allclose(dist.std, ref_std, atol=1e-6, rtol=1e-6)

    # Also exercise the small-batch XLA fast path (default threshold).
    dist_fast = diag_gaussian(x, w, b, logstd)
    jax.block_until_ready(dist_fast.mean)
    assert jnp.allclose(dist_fast.mean, ref_mean, atol=1e-5, rtol=1e-5)

    # Sanity-check the distribution glue (pure JAX, same math as torch Normal).
    lp = dist.log_probs(ref_mean)
    ent = dist.entropy()
    ref_lp = (-jnp.log(ref_std) - 0.5 * jnp.log(2.0 * jnp.pi)).sum(-1)
    ref_ent = (0.5 + 0.5 * jnp.log(2.0 * jnp.pi) + jnp.log(ref_std)).sum(-1)
    assert jnp.allclose(lp, ref_lp, atol=1e-5, rtol=1e-5)
    assert jnp.allclose(ent, ref_ent, atol=1e-5, rtol=1e-5)

    print("KERNEL_OK")
</pallas_src>

<mosaic_0001>
module attributes {stable_mosaic.version = 11 : i64} {
  func.func @_mean_kernel(%arg0: i32, %arg1: memref<8x32xf32, #tpu.memory_space<vmem>>, %arg2: memref<32x8xf32, #tpu.memory_space<vmem>>, %arg3: memref<1x8xf32, #tpu.memory_space<vmem>>, %arg4: memref<8x8xf32, #tpu.memory_space<vmem>>) attributes {dimension_semantics = [#tpu.dimension_semantics<parallel>], iteration_bounds = array<i64: 1>, scalar_prefetch = 0 : i64, scratch_operands = 0 : i64, tpu.core_type = #tpu.core_type<tc>, window_params = [{transform_indices = @transform_0, window_bounds = array<i64: 8, 32>}, {pipeline_mode = #tpu.pipeline_mode<synchronous>, transform_indices = @transform_1, window_bounds = array<i64: 32, 8>}, {pipeline_mode = #tpu.pipeline_mode<synchronous>, transform_indices = @transform_2, window_bounds = array<i64: 1, 8>}, {transform_indices = @transform_3, window_bounds = array<i64: 8, 8>}]} {
    %c0 = arith.constant 0 : index
    %c0_0 = arith.constant 0 : index
    %0 = vector.load %arg1[%c0, %c0_0] : memref<8x32xf32, #tpu.memory_space<vmem>>, vector<8x32xf32>
    %c0_1 = arith.constant 0 : index
    %c0_2 = arith.constant 0 : index
    %1 = vector.load %arg2[%c0_1, %c0_2] : memref<32x8xf32, #tpu.memory_space<vmem>>, vector<32x8xf32>
    %cst = arith.constant dense<0.000000e+00> : vector<8x8xf32>
    %2 = tpu.matmul %0, %1, %cst {dimension_numbers = #tpu.dot_dimension_numbers<[1], [0], [0], [1], [0, 0, 1, 1], [], []>} : vector<8x32xf32>, vector<32x8xf32>, vector<8x8xf32> -> vector<8x8xf32>
    %c0_3 = arith.constant 0 : index
    %c0_4 = arith.constant 0 : index
    %3 = vector.load %arg3[%c0_3, %c0_4] : memref<1x8xf32, #tpu.memory_space<vmem>>, vector<1x8xf32>
    %4 = vector.broadcast %3 : vector<1x8xf32> to vector<8x8xf32>
    %5 = arith.addf %2, %4 : vector<8x8xf32>
    %c0_5 = arith.constant 0 : index
    %c0_6 = arith.constant 0 : index
    %6 = vector.load %arg4[%c0_5, %c0_6] : memref<8x8xf32, #tpu.memory_space<vmem>>, vector<8x8xf32>
    tpu.vector_store %arg4[%c0_5, %c0_6], %5 {strides = array<i32>} : memref<8x8xf32, #tpu.memory_space<vmem>>, vector<8x8xf32>,
    return
  }
  func.func @transform_0(%arg0: i32) -> (i32, i32) {
    %c0_i32 = arith.constant 0 : i32
    %c0_i32_0 = arith.constant 0 : i32
    return %arg0, %c0_i32 : i32, i32
  }
  func.func @transform_1(%arg0: i32) -> (i32, i32) {
    %c0_i32 = arith.constant 0 : i32
    %c0_i32_0 = arith.constant 0 : i32
    %c0_i32_1 = arith.constant 0 : i32
    return %c0_i32, %c0_i32_0 : i32, i32
  }
  func.func @transform_2(%arg0: i32) -> (i32, i32) {
    %c0_i32 = arith.constant 0 : i32
    %c0_i32_0 = arith.constant 0 : i32
    %c0_i32_1 = arith.constant 0 : i32
    return %c0_i32, %c0_i32_0 : i32, i32
  }
  func.func @transform_3(%arg0: i32) -> (i32, i32) {
    %c0_i32 = arith.constant 0 : i32
    %c0_i32_0 = arith.constant 0 : i32
    return %arg0, %c0_i32 : i32, i32
  }
}

</mosaic_0001>

<bundles_post_ra>
// kernel: diag_gaussian_forward.1
= control target key start
LH: loop header
LB: loop body
LE: loop exit
PB: predicated region body
PF: predicated region fallthrough
CT: control target
= control target key end

     0   :  { %s137_s0 = inlined_call_operand.vmem [shape: f32[8,32], index: 0, kind: input, shape index: {}]   ;;  %s138_s1 = inlined_call_operand.vmem [shape: f32[32,8], index: 1, kind: input, shape index: {}]   ;;  %s139_s2 = inlined_call_operand.vmem [shape: f32[1,8], index: 2, kind: input, shape index: {}]   ;;  %s140_s3 = inlined_call_operand.hbm [shape: f32[8,8], index: 3, kind: output, shape index: {}]  }
   0x1   :  { %v19_v0 = vld [vmem:[%s138_s1 + $0x18] sm:$0xff]  ;;  %v18_v1 = vld [vmem:[%s138_s1 + $0x10] sm:$0xff]  ;;  %v17_v2 = vld [vmem:[%s138_s1 + $0x8] sm:$0xff] }
   0x2   :  { %40 = vmatpush.msra.mxu0 %v19_v0 }
   0x3   :  { %8 = vsyncpa [#allocation3], 0  ;;  %v16_v3 = vld [vmem:[%s138_s1] sm:$0xff]  ;;  %vm24_vm0 = vcmask 261120   ;;  %s95_s24 = smov [#allocation2]   ;;  %s57_s28 = sshll.u32 %s140_s3, 4  ;;  %s58_s28 = int_to_ptr.hbm [resolvable:$true] %s57_s28 }
   0x4   :  { %41 = vmatpush.msra.mxu0 %v18_v1  ;;  %v15_v4 = vld [vmem:[%s137_s0] sm:$0xff]  ;;  %s55_s25 = sshll.u32 %s95_s24, 4  ;;  %vm48_vm1 = vcmask 64512   ;;  %s56_s25 = int_to_ptr.vmem [resolvable:$true] %s55_s25 }
   0x5   :  { %v68_v5 = vld [vmem:[%s139_s2] ss:$0 sm:$0xff] }
   0x6   :  { %42 = vmatpush.msra.mxu0 %v17_v2 }
   0x8   :  { %43 = vmatpush.msra.mxu0 %v16_v3 }
   0x9   :  { %66 = vmatmul.msk.f32.vlgmr.msra.gmra.mxu0 %vm24_vm0, %v15_v4 }
  0x86   :  { %v45_v6 = vpop.f32.mrf.mxu0 }
  0x87   :  { %v46_v7 = vadd.f32 %v68_v5, %v45_v6 }
  0x89   :  { %49 = vst.msk [vmem:[#allocation2] sm:$0xff] %vm48_vm1, %v46_v7 }
  0x8a   :  { %60 = dma.vmem_to_hbm [thread:$0]  %s56_s25, 128, %s58_s28, [#allocation3]  }
  0x8b   :  { %93 = dma.done.wait [#allocation3], 128  }
  0x8c   :  { %94 = vsyncadd [#allocation3], 4294967168 }
  0x8d   :  { %65 = vsyncpa [#allocation3], 1 }

</bundles_post_ra>
